<compile_context>
chip_gen: v5e
topology: v5e:2x2
jax: 0.10.0
libtpu: 0.0.40
codegen_flags: <defaults>
</compile_context>

<pallas_src>
import jax
import jax.numpy as jnp
from jax.experimental import pallas as pl
from jax.experimental.pallas import tpu as pltpu

IMAGE_SIZE = 100
H_DIM = 200
Z_DIM = 50

IP = 128            # lane-padded image_size (output slot width)
HP = 256            # lane-padded h_dim
ZP = 128            # lane-padded z_dim (slot width in fused head / output slab)
OUT_W = IP + 2 * ZP  # 384: xrec | mu | log_var output slab

MAX_TILE_B = 1024   # large batch tile to amortize per-grid-step overhead


def _round_up(n, m):
    return ((n + m - 1) // m) * m


def vae_kernel(x_ref, eps_ref,
               w1_ref, b1_ref, w23_ref, b23_ref,
               w4_ref, b4_ref, w5_ref, b5_ref,
               out_ref):
    """One batch tile of the VAE forward: encode -> reparameterize -> decode.

    Matmul inputs are bf16 (MXU-native) with f32 accumulation; biases and
    elementwise math stay f32.
    """
    # ---- encode ----
    x = x_ref[...].astype(jnp.bfloat16)                            # (tb, 100)
    h = jnp.dot(x, w1_ref[...], preferred_element_type=jnp.float32) + b1_ref[...]
    h = jnp.maximum(h, 0.0).astype(jnp.bfloat16)                   # (tb, HP)

    # Fused mu / log_var head: single (HP, 2*ZP) matmul fills the 256-wide MXU.
    muvar = jnp.dot(h, w23_ref[...], preferred_element_type=jnp.float32) + b23_ref[...]
    mu = muvar[:, :Z_DIM]                                          # (tb, 50)
    log_var = muvar[:, ZP:ZP + Z_DIM]                              # (tb, 50)

    # ---- reparameterize ----
    std = jnp.exp(log_var * 0.5)
    z = mu + eps_ref[...].astype(jnp.float32) * std                # (tb, 50)

    # ---- decode ----
    h2 = jnp.dot(z.astype(jnp.bfloat16), w4_ref[...],
                 preferred_element_type=jnp.float32) + b4_ref[...]
    h2 = jnp.maximum(h2, 0.0).astype(jnp.bfloat16)                 # (tb, HP)
    logits = jnp.dot(h2, w5_ref[...], preferred_element_type=jnp.float32) + b5_ref[...]

    # One lane-dense output slab: xrec | mu | log_var (z recomputed in wrapper).
    out_ref[:, :IP] = jax.nn.sigmoid(logits)
    out_ref[:, IP:] = muvar


def _pad_cast(a, shape, dtype):
    """Zero-pad 2-D array `a` into `shape` and cast to `dtype` (tiny weights only)."""
    out = jnp.zeros(shape, dtype)
    return out.at[:a.shape[0], :a.shape[1]].set(a.astype(dtype))


@jax.jit
def vae_forward(x, eps, params):
    """x: (B, 100) float; eps: (B, 50) float (any float dtype, e.g. bf16).

    params: dict with w1..w5 stored (in, out) and b1..b5 stored (1, out), f32.
    Returns (x_reconst, mu, log_var, z) matching the PyTorch module's forward.
    """
    B = x.shape[0]
    tile_b = min(MAX_TILE_B, _round_up(B, 8))   # adaptive tile for small batches
    n_tiles = pl.cdiv(B, tile_b)

    # ---- weight prep (tiny, stays VMEM-resident inside the kernel) ----
    w1 = _pad_cast(params["w1"], (IMAGE_SIZE, HP), jnp.bfloat16)   # K = 100 (natural)
    b1 = _pad_cast(params["b1"], (1, HP), jnp.float32)
    # Fused mu/log_var weights: mu cols at [0:50), log_var cols at [128:178).
    w23 = jnp.zeros((HP, 2 * ZP), jnp.bfloat16)
    w23 = w23.at[:H_DIM, :Z_DIM].set(params["w2"].astype(jnp.bfloat16))
    w23 = w23.at[:H_DIM, ZP:ZP + Z_DIM].set(params["w3"].astype(jnp.bfloat16))
    b23 = jnp.zeros((1, 2 * ZP), jnp.float32)
    b23 = b23.at[:, :Z_DIM].set(params["b2"].astype(jnp.float32))
    b23 = b23.at[:, ZP:ZP + Z_DIM].set(params["b3"].astype(jnp.float32))
    w4 = _pad_cast(params["w4"], (Z_DIM, HP), jnp.bfloat16)        # K = 50 (natural)
    b4 = _pad_cast(params["b4"], (1, HP), jnp.float32)
    w5 = _pad_cast(params["w5"], (HP, IP), jnp.bfloat16)
    b5 = _pad_cast(params["b5"], (1, IP), jnp.float32)

    def row_spec(d):                      # batch-tiled tensors (full last dim)
        return pl.BlockSpec((tile_b, d), lambda i: (i, 0))

    def full_spec(r, c):                  # VMEM-resident weights / biases
        return pl.BlockSpec((r, c), lambda i: (0, 0))

    in_specs = [
        row_spec(IMAGE_SIZE),                          # x    (tile_b, 100)
        row_spec(Z_DIM),                               # eps  (tile_b, 50)
        full_spec(IMAGE_SIZE, HP), full_spec(1, HP),   # w1, b1
        full_spec(HP, 2 * ZP),     full_spec(1, 2 * ZP),  # w23, b23
        full_spec(Z_DIM, HP),      full_spec(1, HP),   # w4, b4
        full_spec(HP, IP),         full_spec(1, IP),   # w5, b5
    ]
    out_specs = row_spec(OUT_W)
    out_shape = jax.ShapeDtypeStruct((B, OUT_W), jnp.float32)

    # Advisory cost hint for the XLA scheduler.
    matmul_flops = 2 * B * (IMAGE_SIZE * HP + HP * 2 * ZP + Z_DIM * HP + HP * IP)
    weight_bytes = (2 * (IMAGE_SIZE * HP + HP * 2 * ZP + Z_DIM * HP + HP * IP)
                    + 4 * (HP + 2 * ZP + HP + IP))
    io_bytes = B * (IMAGE_SIZE * 4 + Z_DIM * 2 + OUT_W * 4)
    cost = pl.CostEstimate(flops=matmul_flops,
                           transcendentals=B * (Z_DIM + IP),
                           bytes_accessed=weight_bytes + io_bytes)

    out = pl.pallas_call(
        vae_kernel,
        out_shape=out_shape,
        grid_spec=pltpu.PrefetchScalarGridSpec(
            num_scalar_prefetch=0,
            grid=(n_tiles,),
            in_specs=in_specs,
            out_specs=out_specs,
        ),
        compiler_params=pltpu.CompilerParams(
            dimension_semantics=("parallel",),          # megacore sharding on v7x
            vmem_limit_bytes=32 * 1024 * 1024,          # covers v5e's 16 MiB default
        ),
        cost_estimate=cost,
    )(x, eps, w1, b1, w23, b23, w4, b4, w5, b5)

    x_reconst = out[:, :IMAGE_SIZE]
    mu = out[:, IP:IP + Z_DIM]
    log_var = out[:, IP + ZP:IP + ZP + Z_DIM]
    # z recomputed with the exact same elementwise math the kernel used for decode.
    z = mu + eps.astype(jnp.float32) * jnp.exp(0.5 * log_var)
    return x_reconst, mu, log_var, z


def init_params(key):
    """Deterministic init mimicking nn.Linear's U(-1/sqrt(fan_in), 1/sqrt(fan_in))."""
    dims = [(IMAGE_SIZE, H_DIM), (H_DIM, Z_DIM), (H_DIM, Z_DIM),
            (Z_DIM, H_DIM), (H_DIM, IMAGE_SIZE)]
    params = {}
    keys = jax.random.split(key, 2 * len(dims))
    for i, (fan_in, fan_out) in enumerate(dims):
        bound = 1.0 / (fan_in ** 0.5)
        w = jax.random.uniform(keys[2 * i], (fan_in, fan_out),
                               minval=-bound, maxval=bound, dtype=jnp.float32)
        b = jax.random.uniform(keys[2 * i + 1], (1, fan_out),
                               minval=-bound, maxval=bound, dtype=jnp.float32)
        params[f"w{i + 1}"] = w
        params[f"b{i + 1}"] = b
    return params


def vae_reference(x, eps, p):
    """Pure-JAX f32 reference of the same forward (for correctness check)."""
    h = jnp.maximum(x @ p["w1"] + p["b1"], 0.0)
    mu = h @ p["w2"] + p["b2"]
    log_var = h @ p["w3"] + p["b3"]
    z = mu + eps * jnp.exp(log_var / 2)
    h2 = jnp.maximum(z @ p["w4"] + p["b4"], 0.0)
    x_reconst = jax.nn.sigmoid(h2 @ p["w5"] + p["b5"])
    return x_reconst, mu, log_var, z


if __name__ == "__main__":
    key = jax.random.PRNGKey(0)
    k_x, k_eps, k_p = jax.random.split(key, 3)

    B = 8
    x = jax.random.normal(k_x, (B, IMAGE_SIZE), dtype=jnp.float32)
    eps = jax.random.normal(k_eps, (B, Z_DIM), dtype=jnp.bfloat16)  # noise: bf16 is plenty
    params = init_params(k_p)

    outs = jax.block_until_ready(vae_forward(x, eps, params))
    refs = vae_reference(x, eps.astype(jnp.float32), params)

    names = ("x_reconst", "mu", "log_var", "z")
    for name, o, r in zip(names, outs, refs):
        assert o.shape == r.shape and o.dtype == r.dtype, name
        # bf16 matmul inputs (f32 accumulation) vs f32 reference -> loose tol.
        assert jnp.allclose(o, r, atol=3e-2, rtol=3e-2), name

    print("KERNEL_OK")
</pallas_src>

<mosaic_0001>
module attributes {stable_mosaic.version = 11 : i64} {
  func.func @vae_kernel(%arg0: i32, %arg1: memref<8x100xf32, #tpu.memory_space<vmem>>, %arg2: memref<8x50xbf16, #tpu.memory_space<vmem>>, %arg3: memref<100x256xbf16, #tpu.memory_space<vmem>>, %arg4: memref<1x256xf32, #tpu.memory_space<vmem>>, %arg5: memref<256x256xbf16, #tpu.memory_space<vmem>>, %arg6: memref<1x256xf32, #tpu.memory_space<vmem>>, %arg7: memref<50x256xbf16, #tpu.memory_space<vmem>>, %arg8: memref<1x256xf32, #tpu.memory_space<vmem>>, %arg9: memref<256x128xbf16, #tpu.memory_space<vmem>>, %arg10: memref<1x128xf32, #tpu.memory_space<vmem>>, %arg11: memref<8x384xf32, #tpu.memory_space<vmem>>) attributes {dimension_semantics = [#tpu.dimension_semantics<parallel>], iteration_bounds = array<i64: 1>, scalar_prefetch = 0 : i64, scratch_operands = 0 : i64, tpu.core_type = #tpu.core_type<tc>, window_params = [{transform_indices = @transform_0, window_bounds = array<i64: 8, 100>}, {transform_indices = @transform_1, window_bounds = array<i64: 8, 50>}, {pipeline_mode = #tpu.pipeline_mode<synchronous>, transform_indices = @transform_2, window_bounds = array<i64: 100, 256>}, {pipeline_mode = #tpu.pipeline_mode<synchronous>, transform_indices = @transform_3, window_bounds = array<i64: 1, 256>}, {pipeline_mode = #tpu.pipeline_mode<synchronous>, transform_indices = @transform_4, window_bounds = array<i64: 256, 256>}, {pipeline_mode = #tpu.pipeline_mode<synchronous>, transform_indices = @transform_5, window_bounds = array<i64: 1, 256>}, {pipeline_mode = #tpu.pipeline_mode<synchronous>, transform_indices = @transform_6, window_bounds = array<i64: 50, 256>}, {pipeline_mode = #tpu.pipeline_mode<synchronous>, transform_indices = @transform_7, window_bounds = array<i64: 1, 256>}, {pipeline_mode = #tpu.pipeline_mode<synchronous>, transform_indices = @transform_8, window_bounds = array<i64: 256, 128>}, {pipeline_mode = #tpu.pipeline_mode<synchronous>, transform_indices = @transform_9, window_bounds = array<i64: 1, 128>}, {transform_indices = @transform_10, window_bounds = array<i64: 8, 384>}]} {
    %c0 = arith.constant 0 : index
    %c0_0 = arith.constant 0 : index
    %0 = vector.load %arg1[%c0, %c0_0] : memref<8x100xf32, #tpu.memory_space<vmem>>, vector<8x100xf32>
    %1 = arith.truncf %0 : vector<8x100xf32> to vector<8x100xbf16>
    %c0_1 = arith.constant 0 : index
    %c0_2 = arith.constant 0 : index
    %2 = vector.load %arg3[%c0_1, %c0_2] : memref<100x256xbf16, #tpu.memory_space<vmem>>, vector<100x256xbf16>
    %cst = arith.constant dense<0.000000e+00> : vector<8x256xf32>
    %3 = tpu.matmul %1, %2, %cst {dimension_numbers = #tpu.dot_dimension_numbers<[1], [0], [0], [1], [0, 0, 1, 1], [], []>} : vector<8x100xbf16>, vector<100x256xbf16>, vector<8x256xf32> -> vector<8x256xf32>
    %c0_3 = arith.constant 0 : index
    %c0_4 = arith.constant 0 : index
    %4 = vector.load %arg4[%c0_3, %c0_4] : memref<1x256xf32, #tpu.memory_space<vmem>>, vector<1x256xf32>
    %5 = vector.broadcast %4 : vector<1x256xf32> to vector<8x256xf32>
    %6 = arith.addf %3, %5 : vector<8x256xf32>
    %cst_5 = arith.constant 0.000000e+00 : f32
    %7 = vector.broadcast %cst_5 : f32 to vector<8x256xf32>
    %8 = arith.maximumf %6, %7 : vector<8x256xf32>
    %9 = arith.truncf %8 : vector<8x256xf32> to vector<8x256xbf16>
    %c0_6 = arith.constant 0 : index
    %c0_7 = arith.constant 0 : index
    %10 = vector.load %arg5[%c0_6, %c0_7] : memref<256x256xbf16, #tpu.memory_space<vmem>>, vector<256x256xbf16>
    %cst_8 = arith.constant dense<0.000000e+00> : vector<8x256xf32>
    %11 = tpu.matmul %9, %10, %cst_8 {dimension_numbers = #tpu.dot_dimension_numbers<[1], [0], [0], [1], [0, 0, 1, 1], [], []>} : vector<8x256xbf16>, vector<256x256xbf16>, vector<8x256xf32> -> vector<8x256xf32>
    %c0_9 = arith.constant 0 : index
    %c0_10 = arith.constant 0 : index
    %12 = vector.load %arg6[%c0_9, %c0_10] : memref<1x256xf32, #tpu.memory_space<vmem>>, vector<1x256xf32>
    %13 = vector.broadcast %12 : vector<1x256xf32> to vector<8x256xf32>
    %14 = arith.addf %11, %13 : vector<8x256xf32>
    %15 = vector.extract_strided_slice %14 {offsets = [0, 0], sizes = [8, 50], strides = [1, 1]} : vector<8x256xf32> to vector<8x50xf32>
    %16 = vector.extract_strided_slice %14 {offsets = [0, 128], sizes = [8, 50], strides = [1, 1]} : vector<8x256xf32> to vector<8x50xf32>
    %cst_11 = arith.constant 5.000000e-01 : f32
    %17 = vector.broadcast %cst_11 : f32 to vector<8x50xf32>
    %18 = arith.mulf %16, %17 : vector<8x50xf32>
    %19 = math.exp %18 : vector<8x50xf32>
    %c0_12 = arith.constant 0 : index
    %c0_13 = arith.constant 0 : index
    %20 = vector.load %arg2[%c0_12, %c0_13] : memref<8x50xbf16, #tpu.memory_space<vmem>>, vector<8x50xbf16>
    %21 = arith.extf %20 : vector<8x50xbf16> to vector<8x50xf32>
    %22 = arith.mulf %21, %19 : vector<8x50xf32>
    %23 = arith.addf %15, %22 : vector<8x50xf32>
    %24 = arith.truncf %23 : vector<8x50xf32> to vector<8x50xbf16>
    %c0_14 = arith.constant 0 : index
    %c0_15 = arith.constant 0 : index
    %25 = vector.load %arg7[%c0_14, %c0_15] : memref<50x256xbf16, #tpu.memory_space<vmem>>, vector<50x256xbf16>
    %cst_16 = arith.constant dense<0.000000e+00> : vector<8x256xf32>
    %26 = tpu.matmul %24, %25, %cst_16 {dimension_numbers = #tpu.dot_dimension_numbers<[1], [0], [0], [1], [0, 0, 1, 1], [], []>} : vector<8x50xbf16>, vector<50x256xbf16>, vector<8x256xf32> -> vector<8x256xf32>
    %c0_17 = arith.constant 0 : index
    %c0_18 = arith.constant 0 : index
    %27 = vector.load %arg8[%c0_17, %c0_18] : memref<1x256xf32, #tpu.memory_space<vmem>>, vector<1x256xf32>
    %28 = vector.broadcast %27 : vector<1x256xf32> to vector<8x256xf32>
    %29 = arith.addf %26, %28 : vector<8x256xf32>
    %cst_19 = arith.constant 0.000000e+00 : f32
    %30 = vector.broadcast %cst_19 : f32 to vector<8x256xf32>
    %31 = arith.maximumf %29, %30 : vector<8x256xf32>
    %32 = arith.truncf %31 : vector<8x256xf32> to vector<8x256xbf16>
    %c0_20 = arith.constant 0 : index
    %c0_21 = arith.constant 0 : index
    %33 = vector.load %arg9[%c0_20, %c0_21] : memref<256x128xbf16, #tpu.memory_space<vmem>>, vector<256x128xbf16>
    %cst_22 = arith.constant dense<0.000000e+00> : vector<8x128xf32>
    %34 = tpu.matmul %32, %33, %cst_22 {dimension_numbers = #tpu.dot_dimension_numbers<[1], [0], [0], [1], [0, 0, 1, 1], [], []>} : vector<8x256xbf16>, vector<256x128xbf16>, vector<8x128xf32> -> vector<8x128xf32>
    %c0_23 = arith.constant 0 : index
    %c0_24 = arith.constant 0 : index
    %35 = vector.load %arg10[%c0_23, %c0_24] : memref<1x128xf32, #tpu.memory_space<vmem>>, vector<1x128xf32>
    %36 = vector.broadcast %35 : vector<1x128xf32> to vector<8x128xf32>
    %37 = arith.addf %34, %36 : vector<8x128xf32>
    %38 = arith.negf %37 : vector<8x128xf32>
    %39 = math.exp %38 : vector<8x128xf32>
    %cst_25 = arith.constant 1.000000e+00 : f32
    %40 = vector.broadcast %cst_25 : f32 to vector<8x128xf32>
    %41 = arith.addf %40, %39 : vector<8x128xf32>
    %42 = arith.divf %40, %41 : vector<8x128xf32>
    %c0_26 = arith.constant 0 : index
    %c0_27 = arith.constant 0 : index
    %43 = vector.load %arg11[%c0_26, %c0_27] : memref<8x384xf32, #tpu.memory_space<vmem>>, vector<8x128xf32>
    tpu.vector_store %arg11[%c0_26, %c0_27], %42 {strides = array<i32>} : memref<8x384xf32, #tpu.memory_space<vmem>>, vector<8x128xf32>,
    %c0_28 = arith.constant 0 : index
    %c128 = arith.constant 128 : index
    %44 = vector.load %arg11[%c0_28, %c128] : memref<8x384xf32, #tpu.memory_space<vmem>>, vector<8x256xf32>
    tpu.vector_store %arg11[%c0_28, %c128], %14 {strides = array<i32>} : memref<8x384xf32, #tpu.memory_space<vmem>>, vector<8x256xf32>,
    return
  }
  func.func @transform_0(%arg0: i32) -> (i32, i32) {
    %c0_i32 = arith.constant 0 : i32
    %c0_i32_0 = arith.constant 0 : i32
    return %arg0, %c0_i32 : i32, i32
  }
  func.func @transform_1(%arg0: i32) -> (i32, i32) {
    %c0_i32 = arith.constant 0 : i32
    %c0_i32_0 = arith.constant 0 : i32
    return %arg0, %c0_i32 : i32, i32
  }
  func.func @transform_2(%arg0: i32) -> (i32, i32) {
    %c0_i32 = arith.constant 0 : i32
    %c0_i32_0 = arith.constant 0 : i32
    %c0_i32_1 = arith.constant 0 : i32
    return %c0_i32, %c0_i32_0 : i32, i32
  }
  func.func @transform_3(%arg0: i32) -> (i32, i32) {
    %c0_i32 = arith.constant 0 : i32
    %c0_i32_0 = arith.constant 0 : i32
    %c0_i32_1 = arith.constant 0 : i32
    return %c0_i32, %c0_i32_0 : i32, i32
  }
  func.func @transform_4(%arg0: i32) -> (i32, i32) {
    %c0_i32 = arith.constant 0 : i32
    %c0_i32_0 = arith.constant 0 : i32
    %c0_i32_1 = arith.constant 0 : i32
    return %c0_i32, %c0_i32_0 : i32, i32
  }
  func.func @transform_5(%arg0: i32) -> (i32, i32) {
    %c0_i32 = arith.constant 0 : i32
    %c0_i32_0 = arith.constant 0 : i32
    %c0_i32_1 = arith.constant 0 : i32
    return %c0_i32, %c0_i32_0 : i32, i32
  }
  func.func @transform_6(%arg0: i32) -> (i32, i32) {
    %c0_i32 = arith.constant 0 : i32
    %c0_i32_0 = arith.constant 0 : i32
    %c0_i32_1 = arith.constant 0 : i32
    return %c0_i32, %c0_i32_0 : i32, i32
  }
  func.func @transform_7(%arg0: i32) -> (i32, i32) {
    %c0_i32 = arith.constant 0 : i32
    %c0_i32_0 = arith.constant 0 : i32
    %c0_i32_1 = arith.constant 0 : i32
    return %c0_i32, %c0_i32_0 : i32, i32
  }
  func.func @transform_8(%arg0: i32) -> (i32, i32) {
    %c0_i32 = arith.constant 0 : i32
    %c0_i32_0 = arith.constant 0 : i32
    %c0_i32_1 = arith.constant 0 : i32
    return %c0_i32, %c0_i32_0 : i32, i32
  }
  func.func @transform_9(%arg0: i32) -> (i32, i32) {
    %c0_i32 = arith.constant 0 : i32
    %c0_i32_0 = arith.constant 0 : i32
    %c0_i32_1 = arith.constant 0 : i32
    return %c0_i32, %c0_i32_0 : i32, i32
  }
  func.func @transform_10(%arg0: i32) -> (i32, i32) {
    %c0_i32 = arith.constant 0 : i32
    %c0_i32_0 = arith.constant 0 : i32
    return %arg0, %c0_i32 : i32, i32
  }
}

</mosaic_0001>

<bundles_post_ra>
// kernel: vae_forward.1
= control target key start
LH: loop header
LB: loop body
LE: loop exit
PB: predicated region body
PF: predicated region fallthrough
CT: control target
= control target key end

     0   :  { %vm126_vm0 = vcmask 1041408   ;;  %vm122_vm1 = vcmask 818176   ;;  %vm473_vm2 = vcmask 1040384   ;;  %vm469_vm3 = vcmask 408576   ;;  %s1472_s2 = inlined_call_operand.vmem [shape: bf16[100,256], index: 2, kind: input, shape index: {}]   ;;  %s1473_s4 = inlined_call_operand.vmem [shape: bf16[256,256], index: 4, kind: input, shape index: {}]   ;;  %s1474_s0 = inlined_call_operand.vmem [shape: f32[8,100], index: 0, kind: input, shape index: {}]   ;;  %s1475_s3 = inlined_call_operand.vmem [shape: f32[1,256], index: 3, kind: input, shape index: {}]   ;;  %s1476_s6 = inlined_call_operand.vmem [shape: bf16[50,256], index: 6, kind: input, shape index: {}]   ;;  %s1477_s8 = inlined_call_operand.vmem [shape: bf16[256,128], index: 8, kind: input, shape index: {}]   ;;  %s1478_s5 = inlined_call_operand.vmem [shape: f32[1,256], index: 5, kind: input, shape index: {}]   ;;  %s1479_s10 = inlined_call_operand.vmem [shape: f32[8,384], index: 10, kind: output, shape index: {}]   ;;  %s1480_s1 = inlined_call_operand.vmem [shape: bf16[8,50], index: 1, kind: input, shape index: {}]   ;;  %s1481_s9 = inlined_call_operand.vmem [shape: f32[1,128], index: 9, kind: input, shape index: {}]   ;;  %s1482_s7 = inlined_call_operand.vmem [shape: f32[1,256], index: 7, kind: input, shape index: {}]  }
   0x1   :  { %v50_v0 = vld [vmem:[%s1472_s2 + $0x60] sm:$0x33]  ;;  %v736_v3 = vld [vmem:[%s1472_s2 + $0x50] sm:$0xf]  ;;  %v974_v6 = vld [vmem:[%s1472_s2 + $0x54] sm:$0xf0] }
   0x2   :  { %v94_v1 = vunpack.c.l.b16 %v50_v0  ;;  %v95_v2 = vunpack.c.h.b16 %v50_v0  ;;  %v973_v7 = vld [vmem:[%s1472_s2 + $0x54] sm:$0xf]  ;;  %v738_v8 = vld [vmem:[%s1472_s2 + $0x58] sm:$0xf0]  ;;  %v737_v11 = vor.u32 %v974_v6, %v736_v3  ;;  %v728_v13 = vld [vmem:[%s1472_s2 + $0x40] sm:$0xf] }
   0x3   :  { %v741_v12 = vor.u32 %v973_v7, %v738_v8  ;;  %v972_v14 = vld [vmem:[%s1472_s2 + $0x44] sm:$0xf0]  ;;  %v971_v15 = vld [vmem:[%s1472_s2 + $0x44] sm:$0xf]  ;;  %v730_v16 = vld [vmem:[%s1472_s2 + $0x48] sm:$0xf0] }
   0x4   :  { %v108_v4 = vpack.c.b16 %v94_v1, %v94_v1  ;;  %v109_v5 = vpack.c.b16 %v95_v2, %v95_v2  ;;  %v802_v17 = vld [vmem:[%s1473_s4 + $0x70] sm:$0xf]  ;;  %v990_v18 = vld [vmem:[%s1473_s4 + $0x74] sm:$0xf0]  ;;  %v729_v20 = vor.u32 %v972_v14, %v728_v13  ;;  %v733_v21 = vor.u32 %v971_v15, %v730_v16  ;;  %v969_v26 = vld [vmem:[%s1472_s2 + $0x34] sm:$0xf] }
   0x5   :  { %v866_v19 = vld [vmem:[%s1473_s4 + $0xf0] sm:$0xf]  ;;  %v970_v23 = vld [vmem:[%s1472_s2 + $0x34] sm:$0xf0]  ;;  %v803_v24 = vor.u32 %v990_v18, %v802_v17  ;;  %v722_v27 = vld [vmem:[%s1472_s2 + $0x38] sm:$0xf0] }
   0x6   :  { %v128_v9 = vsel %vm126_vm0, %v108_v4, 0  ;;  %v131_v10 = vsel %vm126_vm0, %v109_v5, 0  ;;  %v720_v22 = vld [vmem:[%s1472_s2 + $0x30] sm:$0xf]  ;;  %v1006_v25 = vld [vmem:[%s1473_s4 + $0xf4] sm:$0xf0]  ;;  %v725_v38 = vor.u32 %v969_v26, %v722_v27 }
   0x7   :  { %134 = vmatpush.bf16.msra.mxu0 %v128_v9  ;;  %147 = vmatpush.bf16.msra.mxu1 %v131_v10  ;;  %v867_v28 = vor.u32 %v1006_v25, %v866_v19  ;;  %v794_v29 = vld [vmem:[%s1473_s4 + $0x60] sm:$0xf]  ;;  %v988_v30 = vld [vmem:[%s1473_s4 + $0x64] sm:$0xf0]  ;;  %v721_v37 = vor.u32 %v970_v23, %v720_v22  ;;  %v967_v39 = vld [vmem:[%s1472_s2 + $0x24] sm:$0xf] }
   0x8   :  { %361 = vmatpush.bf16.msra.mxu2 %v803_v24  ;;  %v858_v31 = vld [vmem:[%s1473_s4 + $0xe0] sm:$0xf]  ;;  %v1004_v32 = vld [vmem:[%s1473_s4 + $0xe4] sm:$0xf0]  ;;  %v795_v35 = vor.u32 %v988_v30, %v794_v29  ;;  %v786_v40 = vld [vmem:[%s1473_s4 + $0x50] sm:$0xf] }
   0x9   :  { %v712_v33 = vld [vmem:[%s1472_s2 + $0x20] sm:$0xf]  ;;  %v968_v34 = vld [vmem:[%s1472_s2 + $0x24] sm:$0xf0]  ;;  %374 = vmatpush.bf16.msra.mxu3 %v867_v28  ;;  %v859_v36 = vor.u32 %v1004_v32, %v858_v31  ;;  %v986_v41 = vld [vmem:[%s1473_s4 + $0x54] sm:$0xf0] }
   0xa   :  { %v714_v42 = vld [vmem:[%s1472_s2 + $0x28] sm:$0xf0]  ;;  %v850_v43 = vld [vmem:[%s1473_s4 + $0xd0] sm:$0xf]  ;;  %v1002_v44 = vld [vmem:[%s1473_s4 + $0xd4] sm:$0xf0]  ;;  %v787_v45 = vor.u32 %v986_v41, %v786_v40  ;;  %v713_v49 = vor.u32 %v968_v34, %v712_v33 }
   0xb   :  { %135 = vmatpush.bf16.msra.mxu0 %v737_v11  ;;  %148 = vmatpush.bf16.msra.mxu1 %v741_v12  ;;  %v851_v46 = vor.u32 %v1002_v44, %v850_v43  ;;  %v778_v47 = vld [vmem:[%s1473_s4 + $0x40] sm:$0xf]  ;;  %v984_v48 = vld [vmem:[%s1473_s4 + $0x44] sm:$0xf0]  ;;  %v717_v50 = vor.u32 %v967_v39, %v714_v42  ;;  %v704_v51 = vld [vmem:[%s1472_s2 + $0x10] sm:$0xf] }
   0xc   :  { %362 = vmatpush.bf16.msra.mxu2 %v795_v35  ;;  %v842_v52 = vld [vmem:[%s1473_s4 + $0xc0] sm:$0xf]  ;;  %v1000_v53 = vld [vmem:[%s1473_s4 + $0xc4] sm:$0xf0]  ;;  %v966_v54 = vld [vmem:[%s1472_s2 + $0x14] sm:$0xf0]  ;;  %v779_v57 = vor.u32 %v984_v48, %v778_v47 }
   0xd   :  { %375 = vmatpush.bf16.msra.mxu3 %v859_v36  ;;  %v965_v55 = vld [vmem:[%s1472_s2 + $0x14] sm:$0xf]  ;;  %v706_v56 = vld [vmem:[%s1472_s2 + $0x18] sm:$0xf0]  ;;  %v696_v58 = vld [vmem:[%s1472_s2] sm:$0xf]  ;;  %v843_v59 = vor.u32 %v1000_v53, %v842_v52  ;;  %v705_v62 = vor.u32 %v966_v54, %v704_v51 }
   0xe   :  { %v770_v60 = vld [vmem:[%s1473_s4 + $0x30] sm:$0xf]  ;;  %v982_v61 = vld [vmem:[%s1473_s4 + $0x34] sm:$0xf0]  ;;  %v709_v63 = vor.u32 %v965_v55, %v706_v56  ;;  %v964_v0 = vld [vmem:[%s1472_s2 + $0x4] sm:$0xf0] }
   0xf   :  { %136 = vmatpush.bf16.msra.mxu0 %v729_v20  ;;  %149 = vmatpush.bf16.msra.mxu1 %v733_v21  ;;  %v834_v1 = vld [vmem:[%s1473_s4 + $0xb0] sm:$0xf]  ;;  %v998_v2 = vld [vmem:[%s1473_s4 + $0xb4] sm:$0xf0]  ;;  %v963_v3 = vld [vmem:[%s1472_s2 + $0x4] sm:$0xf]  ;;  %v771_v9 = vor.u32 %v982_v61, %v770_v60  ;;  %v697_v13 = vor.u32 %v964_v0, %v696_v58 }
  0x10   :  { %363 = vmatpush.bf16.msra.mxu2 %v787_v45  ;;  %v698_v4 = vld [vmem:[%s1472_s2 + $0x8] sm:$0xf0]  ;;  %v989_v5 = vld [vmem:[%s1473_s4 + $0x74] sm:$0xf]  ;;  %v804_v6 = vld [vmem:[%s1473_s4 + $0x78] sm:$0xf0]  ;;  %v835_v10 = vor.u32 %v998_v2, %v834_v1 }
  0x11   :  { %376 = vmatpush.bf16.msra.mxu3 %v851_v46  ;;  %v1005_v7 = vld [vmem:[%s1473_s4 + $0xf4] sm:$0xf]  ;;  %v868_v8 = vld [vmem:[%s1473_s4 + $0xf8] sm:$0xf0]  ;;  %v762_v11 = vld [vmem:[%s1473_s4 + $0x20] sm:$0xf]  ;;  %v701_v14 = vor.u32 %v963_v3, %v698_v4  ;;  %v807_v16 = vor.u32 %v989_v5, %v804_v6 }
  0x12   :  { %v980_v12 = vld [vmem:[%s1473_s4 + $0x24] sm:$0xf0]  ;;  %v36_v15 = vld [vmem:[%s1474_s0] sm:$0xff]  ;;  %v871_v17 = vor.u32 %v1005_v7, %v868_v8  ;;  %v796_v21 = vld [vmem:[%s1473_s4 + $0x68] sm:$0xf0] }
  0x13   :  { %137 = vmatpush.bf16.msra.mxu0 %v721_v37  ;;  %150 = vmatpush.bf16.msra.mxu1 %v725_v38  ;;  %v987_v18 = vld [vmem:[%s1473_s4 + $0x64] sm:$0xf]  ;;  %v826_v19 = vld [vmem:[%s1473_s4 + $0xa0] sm:$0xf]  ;;  %v996_v20 = vld [vmem:[%s1473_s4 + $0xa4] sm:$0xf0]  ;;  %v763_v24 = vor.u32 %v980_v12, %v762_v11  ;;  %v37_v25 = vpack.c.bf16 %v36_v15, %v36_v15 }
  0x14   :  { %364 = vmatpush.bf16.msra.mxu2 %v779_v57  ;;  %v1003_v22 = vld [vmem:[%s1473_s4 + $0xe4] sm:$0xf]  ;;  %v860_v23 = vld [vmem:[%s1473_s4 + $0xe8] sm:$0xf0]  ;;  %v827_v26 = vor.u32 %v996_v20, %v826_v19  ;;  %v799_v27 = vor.u32 %v987_v18, %v796_v21  ;;  %v985_v29 = vld [vmem:[%s1473_s4 + $0x54] sm:$0xf] }
  0x15   :  { %377 = vmatpush.bf16.msra.mxu3 %v843_v59  ;;  %v863_v28 = vor.u32 %v1003_v22, %v860_v23  ;;  %v788_v30 = vld [vmem:[%s1473_s4 + $0x58] sm:$0xf0]  ;;  %v1001_v31 = vld [vmem:[%s1473_s4 + $0xd4] sm:$0xf]  ;;  %v983_v35 = vld [vmem:[%s1473_s4 + $0x44] sm:$0xf] }
  0x16   :  { %v852_v32 = vld [vmem:[%s1473_s4 + $0xd8] sm:$0xf0]  ;;  %v791_v33 = vor.u32 %v985_v29, %v788_v30  ;;  %v780_v36 = vld [vmem:[%s1473_s4 + $0x48] sm:$0xf0]  ;;  %v999_v37 = vld [vmem:[%s1473_s4 + $0xc4] sm:$0xf] }
  0x17   :  { %138 = vmatpush.bf16.msra.mxu0 %v713_v49  ;;  %151 = vmatpush.bf16.msra.mxu1 %v717_v50  ;;  %v855_v34 = vor.u32 %v1001_v31, %v852_v32  ;;  %v844_v38 = vld [vmem:[%s1473_s4 + $0xc8] sm:$0xf0]  ;;  %v783_v39 = vor.u32 %v983_v35, %v780_v36  ;;  %v981_v41 = vld [vmem:[%s1473_s4 + $0x34] sm:$0xf]  ;;  %v772_v42 = vld [vmem:[%s1473_s4 + $0x38] sm:$0xf0] }
  0x18   :  { %365 = vmatpush.bf16.msra.mxu2 %v771_v9  ;;  %v847_v40 = vor.u32 %v999_v37, %v844_v38  ;;  %v997_v43 = vld [vmem:[%s1473_s4 + $0xb4] sm:$0xf]  ;;  %v836_v44 = vld [vmem:[%s1473_s4 + $0xb8] sm:$0xf0]  ;;  %v775_v45 = vor.u32 %v981_v41, %v772_v42  ;;  %v979_v47 = vld [vmem:[%s1473_s4 + $0x24] sm:$0xf] }
  0x19   :  { %378 = vmatpush.bf16.msra.mxu3 %v835_v10  ;;  %v839_v46 = vor.u32 %v997_v43, %v836_v44  ;;  %v764_v48 = vld [vmem:[%s1473_s4 + $0x28] sm:$0xf0]  ;;  %v995_v49 = vld [vmem:[%s1473_s4 + $0xa4] sm:$0xf]  ;;  %v754_v53 = vld [vmem:[%s1473_s4 + $0x10] sm:$0xf] }
  0x1a   :  { %v828_v50 = vld [vmem:[%s1473_s4 + $0xa8] sm:$0xf0]  ;;  %v767_v51 = vor.u32 %v979_v47, %v764_v48  ;;  %v978_v54 = vld [vmem:[%s1473_s4 + $0x14] sm:$0xf0]  ;;  %v818_v55 = vld [vmem:[%s1473_s4 + $0x90] sm:$0xf] }
  0x1b   :  { %139 = vmatpush.bf16.msra.mxu0 %v705_v62  ;;  %152 = vmatpush.bf16.msra.mxu1 %v709_v63  ;;  %v831_v52 = vor.u32 %v995_v49, %v828_v50  ;;  %v755_v56 = vor.u32 %v978_v54, %v754_v53  ;;  %v994_v57 = vld [vmem:[%s1473_s4 + $0x94] sm:$0xf0]  ;;  %v977_v58 = vld [vmem:[%s1473_s4 + $0x14] sm:$0xf]  ;;  %v756_v59 = vld [vmem:[%s1473_s4 + $0x18] sm:$0xf0] }
  0x1c   :  { %366 = vmatpush.bf16.msra.mxu2 %v763_v24  ;;  %v819_v60 = vor.u32 %v994_v57, %v818_v55  ;;  %v759_v61 = vor.u32 %v977_v58, %v756_v59  ;;  %v993_v62 = vld [vmem:[%s1473_s4 + $0x94] sm:$0xf]  ;;  %v820_v63 = vld [vmem:[%s1473_s4 + $0x98] sm:$0xf0]  ;;  %v746_v1 = vld [vmem:[%s1473_s4] sm:$0xf] }
  0x1d   :  { %379 = vmatpush.bf16.msra.mxu3 %v827_v26  ;;  %v823_v0 = vor.u32 %v993_v62, %v820_v63  ;;  %v976_v2 = vld [vmem:[%s1473_s4 + $0x4] sm:$0xf0]  ;;  %v810_v3 = vld [vmem:[%s1473_s4 + $0x80] sm:$0xf]  ;;  %v975_v6 = vld [vmem:[%s1473_s4 + $0x4] sm:$0xf] }
  0x1e   :  { %v747_v4 = vor.u32 %v976_v2, %v746_v1  ;;  %v992_v5 = vld [vmem:[%s1473_s4 + $0x84] sm:$0xf0]  ;;  %v748_v7 = vld [vmem:[%s1473_s4 + $0x8] sm:$0xf0]  ;;  %v991_v10 = vld [vmem:[%s1473_s4 + $0x84] sm:$0xf] }
  0x1f   :  { %140 = vmatpush.bf16.msra.mxu0 %v697_v13  ;;  %153 = vmatpush.bf16.msra.mxu1 %v701_v14  ;;  %v811_v8 = vor.u32 %v992_v5, %v810_v3  ;;  %v751_v9 = vor.u32 %v975_v6, %v748_v7  ;;  %v812_v11 = vld [vmem:[%s1473_s4 + $0x88] sm:$0xf0]  ;;  %v51_v13 = vld [vmem:[%s1475_s3] sm:$0x3]  ;;  %v427_v26 = vld [vmem:[%s1476_s6 + $0x30] sm:$0x11] }
  0x20   :  { %367 = vmatpush.bf16.msra.mxu2 %v755_v56  ;;  %v815_v12 = vor.u32 %v991_v10, %v812_v11  ;;  %v53_v14 = vperm.slane %v51_v13, 0  ;;  %v54_v15 = vperm.slane %v51_v13, 1  ;;  %v1011_v35 = vld [vmem:[%s1476_s6 + $0x24] sm:$0xf]  ;;  %v892_v37 = vld [vmem:[%s1476_s6 + $0x28] sm:$0xf0] }
  0x21   :  { %380 = vmatpush.bf16.msra.mxu3 %v819_v60  ;;  %v895_v38 = vor.u32 %v1011_v35, %v892_v37  ;;  %v1009_v41 = vld [vmem:[%s1476_s6 + $0x14] sm:$0xf]  ;;  %v884_v43 = vld [vmem:[%s1476_s6 + $0x18] sm:$0xf0]  ;;  %v1007_v47 = vld [vmem:[%s1476_s6 + $0x4] sm:$0xf] }
  0x22   :  { %742 = vmatmul.msk.bf16.vlgmr.msra.gmra.mxu0 %vm122_vm1, %v37_v25  ;;  %743 = vmatmul.msk.bf16.vlgmr.msra.gmra.mxu1 %vm122_vm1, %v37_v25  ;;  %v887_v44 = vor.u32 %v1009_v41, %v884_v43  ;;  %v876_v49 = vld [vmem:[%s1476_s6 + $0x8] sm:$0xf0]  ;;  %v1019_v53 = vld [vmem:[%s1477_s8 + $0x30] sm:$0xff]  ;;  %v195_v55 = vld [vmem:[%s1478_s5] sm:$0x3] }
  0x23   :  { %387 = vmatpush.bf16.msrb.mxu0 %v807_v16  ;;  %400 = vmatpush.bf16.msrb.mxu1 %v871_v17  ;;  %v879_v50 = vor.u32 %v1007_v47, %v876_v49  ;;  %v1027_v54 = vld [vmem:[%s1477_s8 + $0x70] sm:$0xff]  ;;  %v1018_v56 = vld [vmem:[%s1477_s8 + $0x28] sm:$0xff]  ;;  %v198_v58 = vperm.slane %v195_v55, 1  ;;  %v1025_v62 = vld [vmem:[%s1477_s8 + $0x60] sm:$0xff] }
  0x24   :  { %368 = vmatpush.bf16.msra.mxu2 %v747_v4  ;;  %v1026_v57 = vld [vmem:[%s1477_s8 + $0x68] sm:$0xff]  ;;  %v1016_v2 = vld [vmem:[%s1477_s8 + $0x18] sm:$0xff]  ;;  %v1023_v13 = vld [vmem:[%s1477_s8 + $0x50] sm:$0xff] }
  0x25   :  { %381 = vmatpush.bf16.msra.mxu3 %v811_v8  ;;  %v1024_v3 = vld [vmem:[%s1477_s8 + $0x58] sm:$0xff] }
  0x27   :  { %388 = vmatpush.bf16.msrb.mxu0 %v799_v27  ;;  %401 = vmatpush.bf16.msrb.mxu1 %v863_v28  ;;  %v453_v27 = vunpack.c.l.b16 %v427_v26  ;;  %v454_v28 = vunpack.c.h.b16 %v427_v26  ;;  %v428_v26 = vld [vmem:[%s1482_s7] sm:$0x3] }
  0x29   :  { %v461_v29 = vpack.c.b16 %v453_v27, %v453_v27  ;;  %v462_v30 = vpack.c.b16 %v454_v28, %v454_v28  ;;  %v430_v27 = vperm.slane %v428_v26, 0  ;;  %v431_v28 = vperm.slane %v428_v26, 1 }
  0x2b   :  { %389 = vmatpush.bf16.msrb.mxu0 %v791_v33  ;;  %402 = vmatpush.bf16.msrb.mxu1 %v855_v34  ;;  %v475_v31 = vsel %vm473_vm2, %v461_v29, 0  ;;  %v478_v32 = vsel %vm473_vm2, %v462_v30, 0  ;;  %v890_v33 = vld [vmem:[%s1476_s6 + $0x20] sm:$0xf]  ;;  %v1012_v34 = vld [vmem:[%s1476_s6 + $0x24] sm:$0xf0] }
  0x2c   :  { %v891_v36 = vor.u32 %v1012_v34, %v890_v33 }
  0x2f   :  { %390 = vmatpush.bf16.msrb.mxu0 %v783_v39  ;;  %403 = vmatpush.bf16.msrb.mxu1 %v847_v40  ;;  %v882_v39 = vld [vmem:[%s1476_s6 + $0x10] sm:$0xf]  ;;  %v1010_v40 = vld [vmem:[%s1476_s6 + $0x14] sm:$0xf0] }
  0x30   :  { %v883_v42 = vor.u32 %v1010_v40, %v882_v39  ;;  %v1029_v39 = vld [vmem:[%s1481_s9] ss:$0 sm:$0xff] }
  0x33   :  { %391 = vmatpush.bf16.msrb.mxu0 %v775_v45  ;;  %404 = vmatpush.bf16.msrb.mxu1 %v839_v46  ;;  %v874_v45 = vld [vmem:[%s1476_s6] sm:$0xf]  ;;  %v1008_v46 = vld [vmem:[%s1476_s6 + $0x4] sm:$0xf0] }
  0x34   :  { %v875_v48 = vor.u32 %v1008_v46, %v874_v45 }
  0x37   :  { %392 = vmatpush.bf16.msrb.mxu0 %v767_v51  ;;  %405 = vmatpush.bf16.msrb.mxu1 %v831_v52  ;;  %v1020_v51 = vld [vmem:[%s1477_s8 + $0x38] sm:$0xff] }
  0x38   :  { %v1028_v52 = vld [vmem:[%s1477_s8 + $0x78] sm:$0xff]  ;;  %642 = vmatpush.bf16.msrb.mxu2 %v1020_v51 }
  0x39   :  { %655 = vmatpush.bf16.msrb.mxu3 %v1028_v52 }
  0x3b   :  { %393 = vmatpush.bf16.msrb.mxu0 %v759_v61  ;;  %406 = vmatpush.bf16.msrb.mxu1 %v823_v0  ;;  %v1017_v61 = vld [vmem:[%s1477_s8 + $0x20] sm:$0xff]  ;;  %v197_v0 = vperm.slane %v195_v55, 0 }
  0x3c   :  { %643 = vmatpush.bf16.msrb.mxu2 %v1019_v53 }
  0x3d   :  { %656 = vmatpush.bf16.msrb.mxu3 %v1027_v54 }
  0x3f   :  { %394 = vmatpush.bf16.msrb.mxu0 %v751_v9  ;;  %407 = vmatpush.bf16.msrb.mxu1 %v815_v12  ;;  %v1015_v12 = vld [vmem:[%s1477_s8 + $0x10] sm:$0xff] }
  0x40   :  { %644 = vmatpush.bf16.msrb.mxu2 %v1018_v56 }
  0x41   :  { %657 = vmatpush.bf16.msrb.mxu3 %v1026_v57 }
  0x43   :  { %484 = vmatpush.bf16.msra.mxu0 %v475_v31  ;;  %497 = vmatpush.bf16.msra.mxu1 %v478_v32 }
  0x44   :  { %645 = vmatpush.bf16.msrb.mxu2 %v1017_v61 }
  0x45   :  { %658 = vmatpush.bf16.msrb.mxu3 %v1025_v62 }
  0x47   :  { %485 = vmatpush.bf16.msra.mxu0 %v891_v36  ;;  %498 = vmatpush.bf16.msra.mxu1 %v895_v38 }
  0x48   :  { %646 = vmatpush.bf16.msrb.mxu2 %v1016_v2 }
  0x49   :  { %659 = vmatpush.bf16.msrb.mxu3 %v1024_v3 }
  0x4b   :  { %486 = vmatpush.bf16.msra.mxu0 %v883_v42  ;;  %499 = vmatpush.bf16.msra.mxu1 %v887_v44 }
  0x4c   :  { %647 = vmatpush.bf16.msrb.mxu2 %v1015_v12 }
  0x4d   :  { %660 = vmatpush.bf16.msrb.mxu3 %v1023_v13 }
  0x4f   :  { %487 = vmatpush.bf16.msra.mxu0 %v875_v48  ;;  %500 = vmatpush.bf16.msra.mxu1 %v879_v50 }
  0x9f   :  { %v142_v16 = vpop.f32.mrf.mxu0  ;;  %v155_v17 = vpop.f32.mrf.mxu1 }
  0xa0   :  { %v143_v18 = vadd.f32 %v142_v16, %v53_v14  ;;  %v156_v19 = vadd.f32 %v155_v17, %v54_v15  ;;  %v416_v14 = vld [vmem:[%s1480_s1] sm:$0xf] }
  0xa1   :  { %v417_v15 = vunpack.c.l.bf16 %v416_v14 }
  0xa2   :  { %v159_v20 = vmax.f32 %v143_v18, 0.0  ;;  %v160_v21 = vmax.f32 %v156_v19, 0.0 }
  0xa4   :  { %v161_v22 = vpack.c.bf16 %v159_v20, %v159_v20  ;;  %v162_v23 = vpack.c.bf16 %v160_v21, %v160_v21 }
  0xa6   :  { %369 = vmatmul.bf16.vlgmr.msra.gmra.mxu2 %v161_v22  ;;  %382 = vmatmul.bf16.vlgmr.msra.gmra.mxu3 %v162_v23 }
  0xa7   :  { %395 = vmatmul.bf16.vlgmr.msrb.gmra.mxu0 %v161_v22  ;;  %408 = vmatmul.bf16.vlgmr.msrb.gmra.mxu1 %v162_v23  ;;  %v144_v24 = vpop.f32.mrf.mxu0  ;;  %v157_v25 = vpop.f32.mrf.mxu1  ;;  %v1014_v22 = vld [vmem:[%s1477_s8 + $0x8] sm:$0xff] }
  0xa8   :  { %v1022_v23 = vld [vmem:[%s1477_s8 + $0x48] sm:$0xff]  ;;  %648 = vmatpush.bf16.msrb.mxu2 %v1014_v22  ;;  %v1013_v24 = vld [vmem:[%s1477_s8] sm:$0xff] }
  0xa9   :  { %661 = vmatpush.bf16.msrb.mxu3 %v1022_v23  ;;  %v1021_v25 = vld [vmem:[%s1477_s8 + $0x40] sm:$0xff] }
  0xac   :  { %649 = vmatpush.bf16.msrb.mxu2 %v1013_v24 }
  0xad   :  { %662 = vmatpush.bf16.msrb.mxu3 %v1021_v25 }
 0x124   :  { %v396_v59 = vpop.f32.mrf.mxu0  ;;  %v409_v60 = vpop.f32.mrf.mxu1 }
 0x125   :  { %v397_v63 = vadd.f32 %v396_v59, %v198_v58 }
 0x127   :  { %v410_v1 = vadd.f32 %v409_v60, %v397_v63 }
 0x129   :  { %v413_v4 = vmul.f32 0.5, %v410_v1  ;;  %689 = vst [vmem:[%s1479_s10 + $0x10] sm:$0xff] %v410_v1  ;;  %v370_v5 = vpop.f32.mrf.mxu2  ;;  %v383_v6 = vpop.f32.mrf.mxu3 }
 0x12a   :  { %v371_v7 = vadd.f32 %v370_v5, %v197_v0 }
 0x12b   :  { %v414_v8 = vmul.f32 1.442695, %v413_v4 }
 0x12c   :  { %v384_v9 = vadd.f32 %v383_v6, %v371_v7  ;;  %v398_v10 = vpop.f32.mrf.mxu0  ;;  %v411_v11 = vpop.f32.mrf.mxu1 }
 0x12d   :  { %1030 = vpow2.f32 %v414_v8 }
 0x12e   :  { %688 = vst [vmem:[%s1479_s10 + $0x8] sm:$0xff] %v384_v9 }
 0x131   :  { %v372_v16 = vpop.f32.mrf.mxu2  ;;  %v385_v17 = vpop.f32.mrf.mxu3 }
 0x133   :  { %v1031_v18 = vpop.eup %1030 }
 0x134   :  { %v418_v19 = vmul.f32 %v1031_v18, %v417_v15 }
 0x136   :  { %v419_v20 = vadd.f32 %v418_v19, %v384_v9 }
 0x138   :  { %v420_v21 = vpack.c.bf16 %v419_v20, %v419_v20 }
 0x13a   :  { %896 = vmatmul.msk.bf16.vlgmr.msra.gmra.mxu0 %vm469_vm3, %v420_v21  ;;  %897 = vmatmul.msk.bf16.vlgmr.msra.gmra.mxu1 %vm469_vm3, %v420_v21 }
 0x1b7   :  { %v489_v29 = vpop.f32.mrf.mxu0  ;;  %v502_v30 = vpop.f32.mrf.mxu1 }
 0x1b8   :  { %v490_v31 = vadd.f32 %v489_v29, %v430_v27  ;;  %v503_v32 = vadd.f32 %v502_v30, %v431_v28 }
 0x1ba   :  { %v506_v33 = vmax.f32 %v490_v31, 0.0  ;;  %v507_v34 = vmax.f32 %v503_v32, 0.0 }
 0x1bc   :  { %v508_v35 = vpack.c.bf16 %v506_v33, %v506_v33  ;;  %v509_v36 = vpack.c.bf16 %v507_v34, %v507_v34 }
 0x1be   :  { %650 = vmatmul.bf16.vlgmr.msrb.gmra.mxu2 %v508_v35  ;;  %663 = vmatmul.bf16.vlgmr.msrb.gmra.mxu3 %v509_v36 }
 0x1bf   :  { %v491_v37 = vpop.f32.mrf.mxu0  ;;  %v504_v38 = vpop.f32.mrf.mxu1 }
 0x241   :  { %v651_v40 = vpop.f32.mrf.mxu2  ;;  %v664_v41 = vpop.f32.mrf.mxu3 }
 0x242   :  { %v652_v42 = vadd.f32 %v1029_v39, %v651_v40 }
 0x244   :  { %v665_v43 = vadd.f32 %v664_v41, %v652_v42 }
 0x246   :  { %v962_v44 = vmul.f32 -1.442695, %v665_v43 }
 0x248   :  { %1032 = vpow2.f32 %v962_v44 }
 0x249   :  { %v653_v45 = vpop.f32.mrf.mxu2  ;;  %v666_v46 = vpop.f32.mrf.mxu3 }
 0x24e   :  { %v1033_v47 = vpop.eup %1032 }
 0x24f   :  { %v671_v48 = vadd.f32 1.0, %v1033_v47 }
 0x251   :  { %1034 = vrcp.f32 %v671_v48  ;;  %v683_v52 = vand.u32 2147483648, %v671_v48  ;;  %v681_v54 = vand.u32 2147483647, %v671_v48  ;;  %vm677_vm5 = vweird.f32 %v671_v48 }
 0x253   :  { %v684_v56 = vor.u32 1.1754944e-38, %v683_v52  ;;  %vm682_vm7 = vcmp.eq.f32.partialorder %v681_v54, 8.507059e+37 }
 0x257   :  { %v1035_v49 = vpop.eup %1034 }
 0x258   :  { %v673_v50 = vmul.f32 %v1035_v49, %v671_v48  ;;  %vm678_vm4 = vweird.f32 %v1035_v49 }
 0x259   :  { %vm679_vm6 = vmor %vm677_vm5, %vm678_vm4 }
 0x25a   :  { %v674_v51 = vsub.f32 1.0, %v673_v50 }
 0x25c   :  { %v675_v53 = vmul.f32 %v1035_v49, %v674_v51 }
 0x25e   :  { %v676_v55 = vadd.f32 %v1035_v49, %v675_v53 }
 0x260   :  { %v680_v57 = vsel %vm679_vm6, %v1035_v49, %v676_v55 }
 0x261   :  { %v685_v58 = vsel %vm682_vm7, %v684_v56, %v680_v57 }
 0x262   :  { %687 = vst [vmem:[%s1479_s10] sm:$0xff] %v685_v58 }

</bundles_post_ra>
